<compile_context>
chip_gen: v7x
topology: tpu7x:2x2x1
jax: 0.10.0
libtpu: 0.0.40
codegen_flags: <defaults>
</compile_context>

<pallas_src>
import functools

import jax
import jax.numpy as jnp
from jax.experimental import pallas as pl
from jax.experimental.pallas import tpu as pltpu

_LANE = 128
_TM_MAX = 4096  # 4096x128 f32 block = 2 MiB; 2 inputs x 2 buffers = 8 MiB I/O.


@functools.lru_cache(maxsize=None)
def _tensorcores_per_chip() -> int:
    """Best-effort TensorCores-per-chip (v5e/v6e: 1, v4/v5p/v7x: 2).

    Correctness never depends on this; it only decides whether to split the
    grid into two chunks for cross-TensorCore HBM/VPU concurrency.
    """
    try:
        info = pltpu.get_tpu_info()
        for name in ("num_cores", "core_count", "num_tensorcores",
                     "tensorcores_per_chip"):
            try:
                val = getattr(info, name, None)
                if val is None:
                    continue
                val = int(val)
                if val > 0:
                    return min(val, 2)
            except Exception:
                continue
    except Exception:
        pass
    try:
        kind = jax.devices()[0].device_kind.lower()
    except Exception:
        return 1
    if any(s in kind for s in ("lite", "v5e", "v6e", "v6")):
        return 1
    if any(s in kind for s in ("v4", "v5", "7")):
        return 2
    return 1


def _focal_loss_kernel(x_ref, t_ref, out_ref, acc_ref, *,
                       gamma, scale, tm, lane, acc_rows, steps,
                       num_blocks, rows, has_overflow, has_partial):
    c = pl.program_id(0)            # chunk (parallel axis; TC split on 2-TC chips)
    i = pl.program_id(1)            # block within chunk (reduction axis)
    b = c * steps + i               # logical block index

    @pl.when(i == 0)
    def _init():
        acc_ref[...] = jnp.zeros_like(acc_ref)

    def accumulate():
        x = x_ref[...].astype(jnp.float32)
        t = t_ref[...].astype(jnp.float32)

        # One EUP exp shared by the log term and the sigmoid; EUP reciprocal
        # (approx + one Newton step) instead of a multi-op VPU divide.
        e = jnp.exp(-jnp.abs(x))                    # exp(-|x|) in (0, 1]
        s = 1.0 + e
        bce = jnp.maximum(x, 0.0) - x * t + jnp.log(s)
        r = pl.reciprocal(s, approx=True)
        r = r * (2.0 - s * r)                       # Newton step -> ~1e-7 rel err
        p = jnp.where(x >= 0.0, r, e * r)           # sigmoid(x)
        d = p + t - 2.0 * p * t                     # == 1 - p_t

        # (1 - p_t) ** gamma: small integer gamma -> repeated multiply.
        if float(gamma) == int(gamma) and 0 <= int(gamma) <= 4:
            g = int(gamma)
            mod = jnp.ones_like(d) if g == 0 else d
            for _ in range(max(g - 1, 0)):
                mod = mod * d
        else:
            mod = d ** gamma

        loss = mod * bce            # alpha and 1/N folded into epilogue `scale`

        def add(v):
            acc_ref[...] += v.reshape(tm // acc_rows, acc_rows, lane).sum(axis=0)

        if has_partial:
            # Only the final (partially out-of-range) row-block pays for the
            # mask; keep it a true select so garbage rows can never leak.
            @pl.when(b == num_blocks - 1)
            def _masked():
                row = (jax.lax.broadcasted_iota(jnp.int32, (tm, lane), 0)
                       + b * tm)
                add(jnp.where(row < rows, loss, 0.0))

            @pl.when(b != num_blocks - 1)
            def _plain():
                add(loss)
        else:
            add(loss)

    if has_overflow:
        # Clamped overflow steps (ncores * steps > num_blocks) skip compute.
        pl.when(b < num_blocks)(accumulate)
    else:
        accumulate()

    @pl.when(i == pl.num_programs(1) - 1)
    def _epilogue():
        # Lane-dense (8, 128) partial per chunk; the final tiny cross-lane
        # reduce happens in the wrapper.  alpha / (1/N) applied once here.
        out_ref[0] = (acc_ref[...].reshape(acc_rows // 8, 8, lane).sum(axis=0)
                      * scale)


def _focal_elems(x, t, alpha, gamma):
    """Reference element-wise focal loss (used for the tiny ragged tail)."""
    x = x.astype(jnp.float32)
    t = t.astype(jnp.float32)
    bce = jnp.maximum(x, 0.0) - x * t + jnp.log1p(jnp.exp(-jnp.abs(x)))
    p = jax.nn.sigmoid(x)
    d = p + t - 2.0 * p * t
    return alpha * d ** gamma * bce


def focal_loss(logits, targets, alpha=1.0, gamma=2.0, reduction="mean"):
    assert logits.shape == targets.shape
    n_total = int(logits.size)

    # PyTorch module: mean for 'mean', otherwise sum (including 'none').
    inv_n = 1.0 / n_total if reduction == "mean" else 1.0
    scale = float(alpha) * inv_n

    flat_x = logits.reshape(-1)
    flat_t = targets.reshape(-1)

    rows = n_total // _LANE
    tail = n_total - rows * _LANE

    if rows == 0:
        # Fewer than 128 elements: not worth a kernel launch.
        return jnp.sum(_focal_elems(flat_x, flat_t, alpha, gamma)) * inv_n

    # Lane-dense aligned slab; no padded copy of the bulk data.  (Whether the
    # prefix slice aliases or copies is up to XLA; it never exceeds the old
    # jnp.pad cost and removes all per-element column masking in the kernel.)
    if tail:
        x2d = flat_x[: rows * _LANE].reshape(rows, _LANE)
        t2d = flat_t[: rows * _LANE].reshape(rows, _LANE)
    else:
        x2d = flat_x.reshape(rows, _LANE)
        t2d = flat_t.reshape(rows, _LANE)

    # Row tile: multiple of 8, up to 4096 rows (2 MiB f32 per block).
    TM = min(_TM_MAX, ((rows + 7) // 8) * 8)
    num_blocks = pl.cdiv(rows, TM)

    # Split into 2 chunks only on chips with 2 TensorCores (v7x / megacore);
    # on single-TC chips (v5e / v6e) the split is pure overhead.
    # TODO(synk): verify on v7x hardware that "parallel" shards this axis
    # across both TensorCores; if not, switch to pltpu.CORE_PARALLEL.
    ncores = 2 if (_tensorcores_per_chip() >= 2 and num_blocks >= 2) else 1
    steps = pl.cdiv(num_blocks, ncores)

    has_overflow = ncores * steps > num_blocks
    has_partial = (rows % TM) != 0
    acc_rows = 64 if TM % 64 == 0 else 8

    def in_map(c, i):
        # Clamp so (rare) overflow steps re-read the last block; their compute
        # is skipped inside the kernel.
        return (jnp.minimum(c * steps + i, num_blocks - 1), 0)

    kernel = functools.partial(
        _focal_loss_kernel,
        gamma=float(gamma), scale=scale,
        tm=TM, lane=_LANE, acc_rows=acc_rows, steps=steps,
        num_blocks=num_blocks, rows=rows,
        has_overflow=has_overflow, has_partial=has_partial,
    )

    partials = pl.pallas_call(
        kernel,
        out_shape=jax.ShapeDtypeStruct((ncores, 8, _LANE), jnp.float32),
        grid_spec=pltpu.PrefetchScalarGridSpec(
            num_scalar_prefetch=0,
            grid=(ncores, steps),
            in_specs=[
                pl.BlockSpec((TM, _LANE), in_map),
                pl.BlockSpec((TM, _LANE), in_map),
            ],
            out_specs=pl.BlockSpec((1, 8, _LANE), lambda c, i: (c, 0, 0)),
            scratch_shapes=[pltpu.VMEM((acc_rows, _LANE), jnp.float32)],
        ),
        compiler_params=pltpu.CompilerParams(
            dimension_semantics=("parallel", "arbitrary"),
            vmem_limit_bytes=48 * 1024 * 1024,
        ),
    )(x2d, t2d)

    result = jnp.sum(partials)
    if tail:
        tail_x = flat_x[rows * _LANE:]
        tail_t = flat_t[rows * _LANE:]
        result = result + jnp.sum(_focal_elems(tail_x, tail_t, alpha, gamma)) * inv_n
    return result


def focal_loss_ref(logits, targets, alpha=1.0, gamma=2.0, reduction="mean"):
    x = logits.astype(jnp.float32)
    t = targets.astype(jnp.float32)
    bce = jnp.maximum(x, 0.0) - x * t + jnp.log1p(jnp.exp(-jnp.abs(x)))
    p = jax.nn.sigmoid(x)
    p_t = p * t + (1.0 - p) * (1.0 - t)
    loss = alpha * (1.0 - p_t) ** gamma * bce
    return loss.mean() if reduction == "mean" else loss.sum()


if __name__ == "__main__":
    key = jax.random.PRNGKey(0)
    k1, k2, k3, k4 = jax.random.split(key, 4)

    # Primary test: NCHW binary-classification head, lane-aligned (no tail).
    logits = jax.random.normal(k1, (2, 4, 16, 16), dtype=jnp.float32)
    targets = (jax.random.uniform(k2, (2, 4, 16, 16)) > 0.5).astype(jnp.float32)

    out = focal_loss(logits, targets, alpha=1.0, gamma=2, reduction="mean")
    out = jax.block_until_ready(out)
    ref = focal_loss_ref(logits, targets, alpha=1.0, gamma=2, reduction="mean")
    assert jnp.allclose(out, ref, rtol=2e-5, atol=1e-6), (out, ref)

    # Secondary test: size not a multiple of 128 -> exercises the partial
    # last row-block mask + the jnp tail path (no padded HBM copy).
    logits2 = jax.random.normal(k3, (2, 4, 15, 25), dtype=jnp.float32)
    targets2 = (jax.random.uniform(k4, (2, 4, 15, 25)) > 0.5).astype(jnp.float32)

    out2 = focal_loss(logits2, targets2, alpha=1.0, gamma=2, reduction="mean")
    out2 = jax.block_until_ready(out2)
    ref2 = focal_loss_ref(logits2, targets2, alpha=1.0, gamma=2, reduction="mean")
    assert jnp.allclose(out2, ref2, rtol=2e-5, atol=1e-6), (out2, ref2)

    print("KERNEL_OK")
</pallas_src>

<mosaic_0001>
module attributes {stable_mosaic.version = 11 : i64} {
  func.func @_focal_loss_kernel(%arg0: i32, %arg1: i32, %arg2: memref<16x128xf32, #tpu.memory_space<vmem>>, %arg3: memref<16x128xf32, #tpu.memory_space<vmem>>, %arg4: memref<1x8x128xf32, #tpu.memory_space<vmem>>, %arg5: memref<8x128xf32, #tpu.memory_space<vmem>>) attributes {dimension_semantics = [#tpu.dimension_semantics<parallel>, #tpu.dimension_semantics<arbitrary>], iteration_bounds = array<i64: 1, 1>, scalar_prefetch = 0 : i64, scratch_operands = 1 : i64, tpu.core_type = #tpu.core_type<tc>, window_params = [{transform_indices = @transform_0, window_bounds = array<i64: 16, 128>}, {transform_indices = @transform_1, window_bounds = array<i64: 16, 128>}, {transform_indices = @transform_2, window_bounds = array<i64: 1, 8, 128>}]} {
    %c0_i32 = arith.constant 0 : i32
    %0 = arith.cmpi eq, %arg1, %c0_i32 : i32
    %1 = arith.extui %0 : i1 to i32
    %c0_i32_0 = arith.constant 0 : i32
    %2 = arith.cmpi ne, %1, %c0_i32_0 : i32
    scf.if %2 {
      %cst_16 = arith.constant 0.000000e+00 : f32
      %41 = vector.broadcast %cst_16 : f32 to vector<8x128xf32>
      %c0_17 = arith.constant 0 : index
      %c0_18 = arith.constant 0 : index
      %42 = vector.load %arg5[%c0_17, %c0_18] : memref<8x128xf32, #tpu.memory_space<vmem>>, vector<8x128xf32>
      tpu.vector_store %arg5[%c0_17, %c0_18], %41 {strides = array<i32>} : memref<8x128xf32, #tpu.memory_space<vmem>>, vector<8x128xf32>,
    } else {
    }
    %c0 = arith.constant 0 : index
    %c0_1 = arith.constant 0 : index
    %3 = vector.load %arg2[%c0, %c0_1] : memref<16x128xf32, #tpu.memory_space<vmem>>, vector<16x128xf32>
    %c0_2 = arith.constant 0 : index
    %c0_3 = arith.constant 0 : index
    %4 = vector.load %arg3[%c0_2, %c0_3] : memref<16x128xf32, #tpu.memory_space<vmem>>, vector<16x128xf32>
    %5 = math.absf %3 : vector<16x128xf32>
    %cst = arith.constant 0.000000e+00 : f32
    %6 = vector.broadcast %cst : f32 to vector<16x128xf32>
    %7 = arith.subf %6, %5 : vector<16x128xf32>
    %8 = math.exp %7 : vector<16x128xf32>
    %cst_4 = arith.constant 1.000000e+00 : f32
    %9 = vector.broadcast %cst_4 : f32 to vector<16x128xf32>
    %10 = arith.addf %9, %8 : vector<16x128xf32>
    %cst_5 = arith.constant 0.000000e+00 : f32
    %11 = vector.broadcast %cst_5 : f32 to vector<16x128xf32>
    %12 = arith.maximumf %3, %11 : vector<16x128xf32>
    %13 = arith.mulf %3, %4 : vector<16x128xf32>
    %14 = arith.subf %12, %13 : vector<16x128xf32>
    %15 = math.log %10 : vector<16x128xf32>
    %16 = arith.addf %14, %15 : vector<16x128xf32>
    %17 = tpu.reciprocal %10 {approx = true} : vector<16x128xf32> -> vector<16x128xf32>
    %18 = arith.mulf %10, %17 : vector<16x128xf32>
    %cst_6 = arith.constant 2.000000e+00 : f32
    %19 = vector.broadcast %cst_6 : f32 to vector<16x128xf32>
    %20 = arith.subf %19, %18 : vector<16x128xf32>
    %21 = arith.mulf %17, %20 : vector<16x128xf32>
    %cst_7 = arith.constant 0.000000e+00 : f32
    %22 = vector.broadcast %cst_7 : f32 to vector<16x128xf32>
    %23 = arith.cmpf oge, %3, %22 : vector<16x128xf32>
    %24 = arith.mulf %8, %21 : vector<16x128xf32>
    %25 = arith.select %23, %21, %24 : vector<16x128xi1>, vector<16x128xf32>
    %26 = arith.addf %25, %4 : vector<16x128xf32>
    %cst_8 = arith.constant 2.000000e+00 : f32
    %27 = vector.broadcast %cst_8 : f32 to vector<16x128xf32>
    %28 = arith.mulf %27, %25 : vector<16x128xf32>
    %29 = arith.mulf %28, %4 : vector<16x128xf32>
    %30 = arith.subf %26, %29 : vector<16x128xf32>
    %31 = arith.mulf %30, %30 : vector<16x128xf32>
    %32 = arith.mulf %31, %16 : vector<16x128xf32>
    %c0_9 = arith.constant 0 : index
    %c0_10 = arith.constant 0 : index
    %33 = vector.load %arg5[%c0_9, %c0_10] : memref<8x128xf32, #tpu.memory_space<vmem>>, vector<8x128xf32>
    %34 = vector.shape_cast %32 : vector<16x128xf32> to vector<2x8x128xf32>
    %cst_11 = arith.constant dense<0.000000e+00> : vector<8x128xf32>
    %35 = vector.multi_reduction <add>, %34, %cst_11 [0] : vector<2x8x128xf32> to vector<8x128xf32>
    %36 = arith.addf %33, %35 : vector<8x128xf32>
    %c0_12 = arith.constant 0 : index
    %c0_13 = arith.constant 0 : index
    %37 = vector.load %arg5[%c0_12, %c0_13] : memref<8x128xf32, #tpu.memory_space<vmem>>, vector<8x128xf32>
    tpu.vector_store %arg5[%c0_12, %c0_13], %36 {strides = array<i32>} : memref<8x128xf32, #tpu.memory_space<vmem>>, vector<8x128xf32>,
    %c0_i32_14 = arith.constant 0 : i32
    %38 = arith.cmpi eq, %arg1, %c0_i32_14 : i32
    %39 = arith.extui %38 : i1 to i32
    %c0_i32_15 = arith.constant 0 : i32
    %40 = arith.cmpi ne, %39, %c0_i32_15 : i32
    scf.if %40 {
      %c0_16 = arith.constant 0 : index
      %c0_17 = arith.constant 0 : index
      %41 = vector.load %arg5[%c0_16, %c0_17] : memref<8x128xf32, #tpu.memory_space<vmem>>, vector<8x128xf32>
      %42 = vector.shape_cast %41 : vector<8x128xf32> to vector<1x8x128xf32>
      %cst_18 = arith.constant dense<0.000000e+00> : vector<8x128xf32>
      %43 = vector.multi_reduction <add>, %42, %cst_18 [0] : vector<1x8x128xf32> to vector<8x128xf32>
      %cst_19 = arith.constant 4.8828125E-4 : f32
      %44 = vector.broadcast %cst_19 : f32 to vector<8x128xf32>
      %45 = arith.mulf %43, %44 : vector<8x128xf32>
      %c0_20 = arith.constant 0 : index
      %c0_21 = arith.constant 0 : index
      %c0_22 = arith.constant 0 : index
      %46 = vector.load %arg4[%c0_20, %c0_21, %c0_22] : memref<1x8x128xf32, #tpu.memory_space<vmem>>, vector<1x8x128xf32>
      %47 = vector.shape_cast %46 : vector<1x8x128xf32> to vector<8x128xf32>
      %48 = vector.shape_cast %45 : vector<8x128xf32> to vector<1x8x128xf32>
      tpu.vector_store %arg4[%c0_20, %c0_21, %c0_22], %48 {strides = array<i32>} : memref<1x8x128xf32, #tpu.memory_space<vmem>>, vector<1x8x128xf32>,
    } else {
    }
    return
  }
  func.func @transform_0(%arg0: i32, %arg1: i32) -> (i32, i32) {
    %c1_i32 = arith.constant 1 : i32
    %0 = arith.muli %arg0, %c1_i32 : i32
    %1 = arith.addi %0, %arg1 : i32
    %c0_i32 = arith.constant 0 : i32
    %2 = arith.minsi %1, %c0_i32 : i32
    %c0_i32_0 = arith.constant 0 : i32
    %c0_i32_1 = arith.constant 0 : i32
    return %2, %c0_i32_0 : i32, i32
  }
  func.func @transform_1(%arg0: i32, %arg1: i32) -> (i32, i32) {
    %c1_i32 = arith.constant 1 : i32
    %0 = arith.muli %arg0, %c1_i32 : i32
    %1 = arith.addi %0, %arg1 : i32
    %c0_i32 = arith.constant 0 : i32
    %2 = arith.minsi %1, %c0_i32 : i32
    %c0_i32_0 = arith.constant 0 : i32
    %c0_i32_1 = arith.constant 0 : i32
    return %2, %c0_i32_0 : i32, i32
  }
  func.func @transform_2(%arg0: i32, %arg1: i32) -> (i32, i32, i32) {
    %c0_i32 = arith.constant 0 : i32
    %c0_i32_0 = arith.constant 0 : i32
    %c0_i32_1 = arith.constant 0 : i32
    return %arg0, %c0_i32, %c0_i32_0 : i32, i32, i32
  }
}

</mosaic_0001>

<bundles_post_ra>
// kernel: tpu_custom_call.1
= control target key start
LH: loop header
LB: loop body
LE: loop exit
PB: predicated region body
PF: predicated region fallthrough
CT: control target
= control target key end

     0   :  { %7 = vsyncpa [#allocation4], 0  ;;  %s293_s0 = inlined_call_operand.hbm [shape: f32[16,128], index: 0, kind: input, shape index: {}]   ;;  %s294_s1 = inlined_call_operand.hbm [shape: f32[16,128], index: 1, kind: input, shape index: {}]   ;;  %s295_s2 = inlined_call_operand.hbm [shape: f32[1,8,128], index: 2, kind: output, shape index: {}]  }
   0x1   :  { %8 = vsyncpa [#allocation7], 0 }
   0x2   :  { %9 = vsyncpa [#allocation5], 0  ;;  %s237_s9 = smov [#allocation3]   ;;  %s165_s13 = scalar_lea.hbm %s293_s0, 256 }
   0x3   :  { %s21_s10 = sshll.u32 %s237_s9, 4  ;;  %p166_p0 = scmp.ne.s32.totalorder %s293_s0, %s165_s13  ;;  %s22_s10 = int_to_ptr.vmem [resolvable:$true] %s21_s10 }
   0x4   :  { %p169_p1 = scmp.lt.u32.totalorder %s165_s13, %s293_s0 }
   0x6   :  { %p171_p2 = pnand %p169_p1, %p166_p0 }
   0x8   :  { %174 = shalt.err (!%p171_p2)
}
   0x9   :  { %s175_s18 = scalar_lea.vmem %s22_s10, 256  ;;  %p180_p4 = scmp.lt.s32.totalorder %s22_s10, %s22_s10 }
   0xa   :  { %p176_p3 = scmp.ne.s32.totalorder %s22_s10, %s175_s18  ;;  %p181_p5 = scmp.lt.s32.totalorder %s175_s18, %s175_s18 }
   0xc   :  { %p182_p6 = por %p181_p5, %p180_p4 }
   0xe   :  { %p183_p7 = pnand %p182_p6, %p176_p3 }
  0x10   :  { %186 = shalt.err (!%p183_p7)
}
  0x11   :  { %s238_s19 = smov 128   ;;  %s239_s20 = smov 8  }
  0x12   :  { %27 = dma.hbm_to_vmem [thread:$0]  %s293_s0, 256, %s22_s10, [#allocation4], %s238_s19, %s238_s19, %s239_s20  }
  0x13   :  { %s240_s23 = smov [#allocation6]   ;;  %s187_s27 = scalar_lea.hbm %s294_s1, 256 }
  0x14   :  { %s39_s24 = sshll.u32 %s240_s23, 4  ;;  %p188_p8 = scmp.ne.s32.totalorder %s294_s1, %s187_s27  ;;  %s40_s24 = int_to_ptr.vmem [resolvable:$true] %s39_s24 }
  0x15   :  { %p191_p9 = scmp.lt.u32.totalorder %s187_s27, %s294_s1 }
  0x17   :  { %p193_p10 = pnand %p191_p9, %p188_p8 }
  0x19   :  { %196 = shalt.err (!%p193_p10)
}
  0x1a   :  { %s197_s4 = scalar_lea.vmem %s40_s24, 256  ;;  %p202_p12 = scmp.lt.s32.totalorder %s40_s24, %s40_s24 }
  0x1b   :  { %p198_p11 = scmp.ne.s32.totalorder %s40_s24, %s197_s4  ;;  %p203_p13 = scmp.lt.s32.totalorder %s197_s4, %s197_s4 }
  0x1d   :  { %p204_p0 = por %p203_p13, %p202_p12 }
  0x1f   :  { %p205_p1 = pnand %p204_p0, %p198_p11 }
  0x21   :  { %208 = shalt.err (!%p205_p1)
}
  0x22   :  { %45 = dma.hbm_to_vmem [thread:$0]  %s294_s1, 256, %s40_s24, [#allocation7], %s238_s19, %s238_s19, %s239_s20  }
  0x23   :  { %231 = dma.done.wait [#allocation4], 256  }
  0x24   :  { %232 = vsyncadd [#allocation4], 4294967040 }
  0x25   :  { %233 = dma.done.wait [#allocation7], 256  }
  0x26   :  { %234 = vsyncadd [#allocation7], 4294967040  ;;  %v65_v0 = vld [vmem:[#allocation3] sm:$0xff]  ;;  %v66_v1 = vld [vmem:[#allocation3 + $0x8] sm:$0xff]  ;;  %s241_s1 = smov [#allocation8]  }
  0x27   :  { %v69_v2 = vand.u32 2147483647, %v65_v0  ;;  %v70_v3 = vand.u32 2147483647, %v66_v1  ;;  %v67_v15 = vld [vmem:[#allocation6] sm:$0xff]  ;;  %v68_v18 = vld [vmem:[#allocation6 + $0x8] sm:$0xff] }
  0x28   :  { %v79_v20 = vmax.f32 %v65_v0, 0.0  ;;  %v81_v21 = vmul.f32 %v67_v15, %v65_v0  ;;  %vm99_vm0 = vcmp.ge.f32.partialorder %v65_v0, 0.0  ;;  %v80_v25 = vmax.f32 %v66_v1, 0.0  ;;  %s134_s6 = sshll.u32 %s241_s1, 4  ;;  %s135_s6 = int_to_ptr.vmem [resolvable:$true] %s134_s6 }
  0x29   :  { %v71_v4 = vsub.f32 0.0, %v69_v2  ;;  %v72_v5 = vsub.f32 0.0, %v70_v3  ;;  %v82_v26 = vmul.f32 %v68_v18, %v66_v1  ;;  %vm100_vm1 = vcmp.ge.f32.partialorder %v66_v1, 0.0  ;;  %s209_s7 = scalar_lea.vmem %s135_s6, 128  ;;  %p214_p3 = scmp.lt.s32.totalorder %s135_s6, %s135_s6 }
  0x2a   :  { %v83_v30 = vsub.f32 %v79_v20, %v81_v21  ;;  %p210_p2 = scmp.ne.s32.totalorder %s135_s6, %s209_s7  ;;  %p215_p4 = scmp.lt.s32.totalorder %s209_s7, %s209_s7 }
  0x2b   :  { %v73_v6 = vmul.f32 1.442695, %v71_v4  ;;  %v75_v7 = vmul.f32 1.442695, %v72_v5  ;;  %v84_v36 = vsub.f32 %v80_v25, %v82_v26 }
  0x2c   :  { %p216_p5 = por %p215_p4, %p214_p3 }
  0x2d   :  { %153 = vpow2.f32 %v73_v6 }
  0x2e   :  { %155 = vpow2.f32 %v75_v7  ;;  %p217_p6 = pnand %p216_p5, %p210_p2 }
  0x37   :  { %v154_v8 = vpop.eup %153 }
  0x38   :  { %v156_v9 = vpop.eup %155  ;;  %v77_v10 = vadd.f32 1.0, %v154_v8 }
  0x39   :  { %v78_v11 = vadd.f32 1.0, %v156_v9 }
  0x3a   :  { %157 = vrcp.f32 %v77_v10 }
  0x3b   :  { %159 = vrcp.f32 %v78_v11 }
  0x3c   :  { %161 = vlog2.f32 %v77_v10 }
  0x3d   :  { %163 = vlog2.f32 %v78_v11 }
  0x44   :  { %v158_v12 = vpop.eup %157 }
  0x45   :  { %v160_v13 = vpop.eup %159  ;;  %v93_v14 = vmul.f32 %v158_v12, %v77_v10 }
  0x46   :  { %v94_v16 = vmul.f32 %v160_v13, %v78_v11  ;;  %v162_v24 = vpop.eup %161 }
  0x47   :  { %v95_v17 = vsub.f32 2.0, %v93_v14  ;;  %v164_v28 = vpop.eup %163  ;;  %v86_v32 = vmul.f32 0.6931472, %v162_v24 }
  0x48   :  { %v96_v19 = vsub.f32 2.0, %v94_v16  ;;  %v88_v37 = vmul.f32 0.6931472, %v164_v28 }
  0x49   :  { %v97_v22 = vmul.f32 %v158_v12, %v95_v17  ;;  %v89_v42 = vadd.f32 %v86_v32, %v83_v30 }
  0x4a   :  { %v98_v23 = vmul.f32 %v160_v13, %v96_v19  ;;  %v90_v44 = vadd.f32 %v88_v37, %v84_v36 }
  0x4b   :  { %v101_v27 = vmul.f32 %v154_v8, %v97_v22 }
  0x4c   :  { %v102_v29 = vmul.f32 %v156_v9, %v98_v23 }
  0x4d   :  { %v103_v31 = vsel %vm99_vm0, %v97_v22, %v101_v27 }
  0x4e   :  { %v104_v33 = vsel %vm100_vm1, %v98_v23, %v102_v29  ;;  %v105_v34 = vadd.f32 %v103_v31, %v67_v15  ;;  %v107_v35 = vmul.f32 2.0, %v103_v31 }
  0x4f   :  { %v106_v38 = vadd.f32 %v104_v33, %v68_v18  ;;  %v108_v39 = vmul.f32 2.0, %v104_v33 }
  0x50   :  { %v109_v40 = vmul.f32 %v107_v35, %v67_v15 }
  0x51   :  { %v110_v41 = vmul.f32 %v108_v39, %v68_v18 }
  0x52   :  { %v111_v43 = vsub.f32 %v105_v34, %v109_v40 }
  0x53   :  { %v112_v45 = vsub.f32 %v106_v38, %v110_v41 }
  0x54   :  { %v113_v46 = vmul.f32 %v111_v43, %v111_v43 }
  0x55   :  { %v114_v47 = vmul.f32 %v112_v45, %v112_v45 }
  0x56   :  { %v115_v48 = vmul.f32 %v113_v46, %v89_v42 }
  0x57   :  { %v116_v49 = vmul.f32 %v114_v47, %v90_v44 }
  0x59   :  { %v118_v50 = vadd.f32 %v116_v49, %v115_v48 }
  0x5b   :  { %v126_v51 = vmul.f32 0.00048828125, %v118_v50 }
  0x5d   :  { %127 = vst [vmem:[#allocation8] sm:$0xff] %v126_v51 }
  0x5e   :  { %220 = shalt.err (!%p217_p6)
}
  0x5f   :  { %s221_s10 = scalar_lea.hbm %s295_s2, 128 }
  0x60   :  { %p222_p7 = scmp.ne.s32.totalorder %s295_s2, %s221_s10  ;;  %p225_p8 = scmp.lt.u32.totalorder %s221_s10, %s295_s2 }
  0x62   :  { %p227_p9 = pnand %p225_p8, %p222_p7 }
  0x64   :  { %230 = shalt.err (!%p227_p9)
}
  0x65   :  { %137 = dma.vmem_to_hbm [thread:$0]  %s135_s6, 128, %s295_s2, [#allocation5]  }
  0x66   :  { %235 = dma.done.wait [#allocation5], 128  }
  0x67   :  { %236 = vsyncadd [#allocation5], 4294967168 }
  0x68   :  { %141 = vsyncpa [#allocation4], 1 }
  0x69   :  { %142 = vsyncpa [#allocation7], 1 }
  0x6a   :  { %143 = vsyncpa [#allocation5], 1 }

</bundles_post_ra>
